<compile_context>
chip_gen: v7x
topology: tpu7x:2x2x1
jax: 0.10.0
libtpu: 0.0.40
codegen_flags: <defaults>
</compile_context>

<pallas_src>
import functools

import jax
import jax.numpy as jnp
from jax.experimental import pallas as pl
from jax.experimental.pallas import tpu as pltpu


def _leaky_relu(x, slope=0.1):
    # LeakyReLU with slope < 1: max(x, slope * x).
    return jnp.maximum(x, slope * x)


def _ibp_encoder_kernel(x_ref, w1_ref, b1_ref, w2_ref, b2_ref, wc_ref, bc_ref,
                        pre_ref, fea_ref):
    # x_ref:  (tb, ni)            bf16 stream
    # w1_ref: (ni, nf) bf16, b1_ref: (1, nf) f32
    # w2_ref: (nf, nf) bf16, b2_ref: (1, nf) f32
    # wc_ref: (nf, num_class) bf16, bc_ref: (1, num_class) f32
    x = x_ref[...]

    # fc1 + LeakyReLU(0.1): bf16 x bf16 on the MXU, f32 accumulate + epilogue.
    h1 = jnp.dot(x, w1_ref[...], preferred_element_type=jnp.float32) + b1_ref[...]
    h1 = _leaky_relu(h1)

    # fc2 + LeakyReLU(0.1) -> fea (f32 math, cast only at the store).
    h2 = jnp.dot(h1.astype(w2_ref.dtype), w2_ref[...],
                 preferred_element_type=jnp.float32) + b2_ref[...]
    fea = _leaky_relu(h2)
    fea_ref[...] = fea.astype(fea_ref.dtype)

    # classifier head -> pre, computed from the full-precision fea and stored f32.
    pre = jnp.dot(fea.astype(wc_ref.dtype), wc_ref[...],
                  preferred_element_type=jnp.float32) + bc_ref[...]
    pre_ref[...] = pre.astype(pre_ref.dtype)


def _round_up(x, m):
    return ((x + m - 1) // m) * m


@functools.partial(jax.jit, static_argnames=("block_b",))
def ibp_encoder_forward(x, params, block_b=2048):
    """Pallas forward of IBP_Encoder.

    x: (B, ni) float32 / bfloat16
    params: dict with weights stored (in, out), i.e. torch W^T:
        w1 (ni, nf), b1 (nf,)
        w2 (nf, nf), b2 (nf,)
        wc (nf, num_class), bc (num_class,)
    Returns (pre, fea): pre (B, num_class) float32, fea (B, nf) bfloat16.
    """
    B, ni = x.shape
    nf = params["w1"].shape[1]
    num_class = params["wc"].shape[1]

    stream_dtype = jnp.bfloat16

    # Streamed tensors (x, fea) and the tiny resident weights go to bf16;
    # biases stay f32 (epilogue math on the f32 dot results).
    x_s = x.astype(stream_dtype)
    w1 = params["w1"].astype(stream_dtype)
    w2 = params["w2"].astype(stream_dtype)
    wc = params["wc"].astype(stream_dtype)
    b1 = params["b1"].reshape(1, nf).astype(jnp.float32)
    b2 = params["b2"].reshape(1, nf).astype(jnp.float32)
    bc = params["bc"].reshape(1, num_class).astype(jnp.float32)

    # Batch tile: clamp to the actual batch, rounded to the bf16 sublane
    # multiple (16 rows = 2 packed rows/sublane x 8 sublanes).
    bb = min(block_b, _round_up(B, 16))
    grid = (pl.cdiv(B, bb),)

    # Batch is tiled along the grid; all weights/biases are small (~100 KiB
    # total), have constant index_maps, and stay resident across grid steps.
    x_spec = pl.BlockSpec((bb, ni), lambda i: (i, 0))
    w1_spec = pl.BlockSpec((ni, nf), lambda i: (0, 0))
    b1_spec = pl.BlockSpec((1, nf), lambda i: (0, 0))
    w2_spec = pl.BlockSpec((nf, nf), lambda i: (0, 0))
    b2_spec = pl.BlockSpec((1, nf), lambda i: (0, 0))
    wc_spec = pl.BlockSpec((nf, num_class), lambda i: (0, 0))
    bc_spec = pl.BlockSpec((1, num_class), lambda i: (0, 0))
    pre_spec = pl.BlockSpec((bb, num_class), lambda i: (i, 0))
    fea_spec = pl.BlockSpec((bb, nf), lambda i: (i, 0))

    pre, fea = pl.pallas_call(
        _ibp_encoder_kernel,
        out_shape=(
            jax.ShapeDtypeStruct((B, num_class), jnp.float32),
            jax.ShapeDtypeStruct((B, nf), stream_dtype),
        ),
        grid_spec=pltpu.PrefetchScalarGridSpec(
            num_scalar_prefetch=0,
            grid=grid,
            in_specs=[x_spec, w1_spec, b1_spec, w2_spec, b2_spec, wc_spec, bc_spec],
            out_specs=[pre_spec, fea_spec],
        ),
        compiler_params=pltpu.CompilerParams(
            dimension_semantics=("parallel",)),
    )(x_s, w1, b1, w2, b2, wc, bc)
    return pre, fea


def init_params(key, ni, nf, num_class, dtype=jnp.float32):
    """Deterministic synthetic init (torch Linear default: U(-1/sqrt(fan_in), ...)).

    Weights stored as (in, out), i.e. already transposed relative to torch's (out, in).
    """
    # TODO(synk): the original module loads weights from 'script/weights/ibp_encoder.pth'
    # via torch.load; checkpoint I/O has no in-kernel equivalent, so synthetic init is used.
    k1, k2, k3, k4, k5, k6 = jax.random.split(key, 6)
    s1 = 1.0 / jnp.sqrt(ni)
    s2 = 1.0 / jnp.sqrt(nf)
    return {
        "w1": jax.random.uniform(k1, (ni, nf), dtype, -s1, s1),
        "b1": jax.random.uniform(k2, (nf,), dtype, -s1, s1),
        "w2": jax.random.uniform(k3, (nf, nf), dtype, -s2, s2),
        "b2": jax.random.uniform(k4, (nf,), dtype, -s2, s2),
        "wc": jax.random.uniform(k5, (nf, num_class), dtype, -s2, s2),
        "bc": jax.random.uniform(k6, (num_class,), dtype, -s2, s2),
    }


def reference_forward(x, params):
    h1 = x @ params["w1"] + params["b1"]
    h1 = jnp.where(h1 > 0, h1, 0.1 * h1)
    h2 = h1 @ params["w2"] + params["b2"]
    fea = jnp.where(h2 > 0, h2, 0.1 * h2)
    pre = fea @ params["wc"] + params["bc"]
    return pre, fea


if __name__ == "__main__":
    key = jax.random.PRNGKey(0)
    k_params, k_x = jax.random.split(key)

    ni = 128          # module default
    nf = 128          # module default
    num_class = 3     # module default
    batch = 16        # small test batch

    params = init_params(k_params, ni, nf, num_class)
    x = jax.random.normal(k_x, (batch, ni), dtype=jnp.float32)

    pre, fea = ibp_encoder_forward(x, params)
    jax.block_until_ready((pre, fea))

    # Sanity check against a pure-JAX f32 reference.  The kernel streams
    # x/weights/fea in bf16 (bandwidth optimization), so tolerances are set
    # at the bf16 level (~0.4% relative).
    pre_ref, fea_ref = reference_forward(x, params)
    assert pre.shape == (batch, num_class) and fea.shape == (batch, nf)
    assert pre.dtype == jnp.float32 and fea.dtype == jnp.bfloat16
    assert jnp.allclose(pre, pre_ref, atol=3e-2, rtol=3e-2)
    assert jnp.allclose(fea.astype(jnp.float32), fea_ref, atol=3e-2, rtol=3e-2)

    print("KERNEL_OK")
</pallas_src>

<mosaic_0001>
module attributes {stable_mosaic.version = 11 : i64} {
  func.func @_ibp_encoder_kernel(%arg0: i32, %arg1: memref<16x128xbf16, #tpu.memory_space<vmem>>, %arg2: memref<128x128xbf16, #tpu.memory_space<vmem>>, %arg3: memref<1x128xf32, #tpu.memory_space<vmem>>, %arg4: memref<128x128xbf16, #tpu.memory_space<vmem>>, %arg5: memref<1x128xf32, #tpu.memory_space<vmem>>, %arg6: memref<128x3xbf16, #tpu.memory_space<vmem>>, %arg7: memref<1x3xf32, #tpu.memory_space<vmem>>, %arg8: memref<16x3xf32, #tpu.memory_space<vmem>>, %arg9: memref<16x128xbf16, #tpu.memory_space<vmem>>) attributes {dimension_semantics = [#tpu.dimension_semantics<parallel>], iteration_bounds = array<i64: 1>, scalar_prefetch = 0 : i64, scratch_operands = 0 : i64, tpu.core_type = #tpu.core_type<tc>, window_params = [{transform_indices = @transform_0, window_bounds = array<i64: 16, 128>}, {pipeline_mode = #tpu.pipeline_mode<synchronous>, transform_indices = @transform_1, window_bounds = array<i64: 128, 128>}, {pipeline_mode = #tpu.pipeline_mode<synchronous>, transform_indices = @transform_2, window_bounds = array<i64: 1, 128>}, {pipeline_mode = #tpu.pipeline_mode<synchronous>, transform_indices = @transform_3, window_bounds = array<i64: 128, 128>}, {pipeline_mode = #tpu.pipeline_mode<synchronous>, transform_indices = @transform_4, window_bounds = array<i64: 1, 128>}, {pipeline_mode = #tpu.pipeline_mode<synchronous>, transform_indices = @transform_5, window_bounds = array<i64: 128, 3>}, {pipeline_mode = #tpu.pipeline_mode<synchronous>, transform_indices = @transform_6, window_bounds = array<i64: 1, 3>}, {transform_indices = @transform_7, window_bounds = array<i64: 16, 3>}, {transform_indices = @transform_8, window_bounds = array<i64: 16, 128>}]} {
    %c0 = arith.constant 0 : index
    %c0_0 = arith.constant 0 : index
    %0 = vector.load %arg1[%c0, %c0_0] : memref<16x128xbf16, #tpu.memory_space<vmem>>, vector<16x128xbf16>
    %c0_1 = arith.constant 0 : index
    %c0_2 = arith.constant 0 : index
    %1 = vector.load %arg2[%c0_1, %c0_2] : memref<128x128xbf16, #tpu.memory_space<vmem>>, vector<128x128xbf16>
    %cst = arith.constant dense<0.000000e+00> : vector<16x128xf32>
    %2 = tpu.matmul %0, %1, %cst {dimension_numbers = #tpu.dot_dimension_numbers<[1], [0], [0], [1], [0, 0, 1, 1], [], []>} : vector<16x128xbf16>, vector<128x128xbf16>, vector<16x128xf32> -> vector<16x128xf32>
    %c0_3 = arith.constant 0 : index
    %c0_4 = arith.constant 0 : index
    %3 = vector.load %arg3[%c0_3, %c0_4] : memref<1x128xf32, #tpu.memory_space<vmem>>, vector<1x128xf32>
    %4 = vector.broadcast %3 : vector<1x128xf32> to vector<16x128xf32>
    %5 = arith.addf %2, %4 : vector<16x128xf32>
    %cst_5 = arith.constant 1.000000e-01 : f32
    %6 = vector.broadcast %cst_5 : f32 to vector<16x128xf32>
    %7 = arith.mulf %6, %5 : vector<16x128xf32>
    %8 = arith.maximumf %5, %7 : vector<16x128xf32>
    %9 = arith.truncf %8 : vector<16x128xf32> to vector<16x128xbf16>
    %c0_6 = arith.constant 0 : index
    %c0_7 = arith.constant 0 : index
    %10 = vector.load %arg4[%c0_6, %c0_7] : memref<128x128xbf16, #tpu.memory_space<vmem>>, vector<128x128xbf16>
    %cst_8 = arith.constant dense<0.000000e+00> : vector<16x128xf32>
    %11 = tpu.matmul %9, %10, %cst_8 {dimension_numbers = #tpu.dot_dimension_numbers<[1], [0], [0], [1], [0, 0, 1, 1], [], []>} : vector<16x128xbf16>, vector<128x128xbf16>, vector<16x128xf32> -> vector<16x128xf32>
    %c0_9 = arith.constant 0 : index
    %c0_10 = arith.constant 0 : index
    %12 = vector.load %arg5[%c0_9, %c0_10] : memref<1x128xf32, #tpu.memory_space<vmem>>, vector<1x128xf32>
    %13 = vector.broadcast %12 : vector<1x128xf32> to vector<16x128xf32>
    %14 = arith.addf %11, %13 : vector<16x128xf32>
    %cst_11 = arith.constant 1.000000e-01 : f32
    %15 = vector.broadcast %cst_11 : f32 to vector<16x128xf32>
    %16 = arith.mulf %15, %14 : vector<16x128xf32>
    %17 = arith.maximumf %14, %16 : vector<16x128xf32>
    %18 = arith.truncf %17 : vector<16x128xf32> to vector<16x128xbf16>
    %c0_12 = arith.constant 0 : index
    %c0_13 = arith.constant 0 : index
    %19 = vector.load %arg9[%c0_12, %c0_13] : memref<16x128xbf16, #tpu.memory_space<vmem>>, vector<16x128xbf16>
    tpu.vector_store %arg9[%c0_12, %c0_13], %18 {strides = array<i32>} : memref<16x128xbf16, #tpu.memory_space<vmem>>, vector<16x128xbf16>,
    %20 = arith.truncf %17 : vector<16x128xf32> to vector<16x128xbf16>
    %c0_14 = arith.constant 0 : index
    %c0_15 = arith.constant 0 : index
    %21 = vector.load %arg6[%c0_14, %c0_15] : memref<128x3xbf16, #tpu.memory_space<vmem>>, vector<128x3xbf16>
    %cst_16 = arith.constant dense<0.000000e+00> : vector<16x3xf32>
    %22 = tpu.matmul %20, %21, %cst_16 {dimension_numbers = #tpu.dot_dimension_numbers<[1], [0], [0], [1], [0, 0, 1, 1], [], []>} : vector<16x128xbf16>, vector<128x3xbf16>, vector<16x3xf32> -> vector<16x3xf32>
    %c0_17 = arith.constant 0 : index
    %c0_18 = arith.constant 0 : index
    %23 = vector.load %arg7[%c0_17, %c0_18] : memref<1x3xf32, #tpu.memory_space<vmem>>, vector<1x3xf32>
    %24 = vector.broadcast %23 : vector<1x3xf32> to vector<16x3xf32>
    %25 = arith.addf %22, %24 : vector<16x3xf32>
    %c0_19 = arith.constant 0 : index
    %c0_20 = arith.constant 0 : index
    %26 = vector.load %arg8[%c0_19, %c0_20] : memref<16x3xf32, #tpu.memory_space<vmem>>, vector<16x3xf32>
    tpu.vector_store %arg8[%c0_19, %c0_20], %25 {strides = array<i32>} : memref<16x3xf32, #tpu.memory_space<vmem>>, vector<16x3xf32>,
    return
  }
  func.func @transform_0(%arg0: i32) -> (i32, i32) {
    %c0_i32 = arith.constant 0 : i32
    %c0_i32_0 = arith.constant 0 : i32
    return %arg0, %c0_i32 : i32, i32
  }
  func.func @transform_1(%arg0: i32) -> (i32, i32) {
    %c0_i32 = arith.constant 0 : i32
    %c0_i32_0 = arith.constant 0 : i32
    %c0_i32_1 = arith.constant 0 : i32
    return %c0_i32, %c0_i32_0 : i32, i32
  }
  func.func @transform_2(%arg0: i32) -> (i32, i32) {
    %c0_i32 = arith.constant 0 : i32
    %c0_i32_0 = arith.constant 0 : i32
    %c0_i32_1 = arith.constant 0 : i32
    return %c0_i32, %c0_i32_0 : i32, i32
  }
  func.func @transform_3(%arg0: i32) -> (i32, i32) {
    %c0_i32 = arith.constant 0 : i32
    %c0_i32_0 = arith.constant 0 : i32
    %c0_i32_1 = arith.constant 0 : i32
    return %c0_i32, %c0_i32_0 : i32, i32
  }
  func.func @transform_4(%arg0: i32) -> (i32, i32) {
    %c0_i32 = arith.constant 0 : i32
    %c0_i32_0 = arith.constant 0 : i32
    %c0_i32_1 = arith.constant 0 : i32
    return %c0_i32, %c0_i32_0 : i32, i32
  }
  func.func @transform_5(%arg0: i32) -> (i32, i32) {
    %c0_i32 = arith.constant 0 : i32
    %c0_i32_0 = arith.constant 0 : i32
    %c0_i32_1 = arith.constant 0 : i32
    return %c0_i32, %c0_i32_0 : i32, i32
  }
  func.func @transform_6(%arg0: i32) -> (i32, i32) {
    %c0_i32 = arith.constant 0 : i32
    %c0_i32_0 = arith.constant 0 : i32
    %c0_i32_1 = arith.constant 0 : i32
    return %c0_i32, %c0_i32_0 : i32, i32
  }
  func.func @transform_7(%arg0: i32) -> (i32, i32) {
    %c0_i32 = arith.constant 0 : i32
    %c0_i32_0 = arith.constant 0 : i32
    return %arg0, %c0_i32 : i32, i32
  }
  func.func @transform_8(%arg0: i32) -> (i32, i32) {
    %c0_i32 = arith.constant 0 : i32
    %c0_i32_0 = arith.constant 0 : i32
    return %arg0, %c0_i32 : i32, i32
  }
}

</mosaic_0001>

<bundles_post_ra>
// kernel: ibp_encoder_forward.1
= control target key start
LH: loop header
LB: loop body
LE: loop exit
PB: predicated region body
PF: predicated region fallthrough
CT: control target
= control target key end

     0   :  { %v594_v1 = vmov 0.0   ;;  %vm595_vm0 = vmmov 0   ;;  %s776_s0 = inlined_call_operand.vmem [shape: bf16[16,128], index: 0, kind: input, shape index: {}]   ;;  %s777_s1 = inlined_call_operand.vmem [shape: bf16[128,128], index: 1, kind: input, shape index: {}]   ;;  %s778_s2 = inlined_call_operand.vmem [shape: f32[1,128], index: 2, kind: input, shape index: {}]   ;;  %s779_s3 = inlined_call_operand.vmem [shape: bf16[128,128], index: 3, kind: input, shape index: {}]   ;;  %s780_s4 = inlined_call_operand.vmem [shape: f32[1,128], index: 4, kind: input, shape index: {}]   ;;  %s781_s5 = inlined_call_operand.vmem [shape: bf16[128,3], index: 5, kind: input, shape index: {}]   ;;  %s782_s6 = inlined_call_operand.vmem [shape: f32[1,3], index: 6, kind: input, shape index: {}]   ;;  %s783_s7 = inlined_call_operand.vmem [shape: f32[16,3], index: 7, kind: output, shape index: {0}]   ;;  %s784_s8 = inlined_call_operand.hbm [shape: bf16[16,128], index: 8, kind: output, shape index: {1}]  }
   0x1   :  { %v545_v0 = vld [vmem:[%s777_s1] sm:$0xff]   ;;  %480 = vmatprep.subr.bf16.mxu0 %v594_v1  ;;  %500 = vmatprep.subr.bf16.mxu1 %v594_v1  ;;  %v546_v2 = vld [vmem:[%s777_s1 + $0x8] sm:$0xff]   ;;  %v547_v3 = vld [vmem:[%s777_s1 + $0x10] sm:$0xff]  }
   0x2   :  { %481 = vmatpush3.bf16.msra.mxu0 %v545_v0  ;;  %496 = vmatprep.mubr.msk.bf16.mxu0 %vm595_vm0, %v594_v1  ;;  %v554_v4 = vld [vmem:[%s779_s3] sm:$0xff]   ;;  %v548_v5 = vld [vmem:[%s777_s1 + $0x18] sm:$0xff]   ;;  %v555_v6 = vld [vmem:[%s779_s3 + $0x8] sm:$0xff]  }
   0x3   :  { %482 = vmatprep.subr.bf16.mxu0 %v594_v1  ;;  %516 = vmatprep.mubr.msk.bf16.mxu1 %vm595_vm0, %v594_v1  ;;  %v549_v7 = vld [vmem:[%s777_s1 + $0x20] sm:$0xff]   ;;  %v556_v8 = vld [vmem:[%s779_s3 + $0x10] sm:$0xff]   ;;  %v550_v9 = vld [vmem:[%s777_s1 + $0x28] sm:$0xff]  }
   0x4   :  { %501 = vmatpush3.bf16.msra.mxu1 %v554_v4  ;;  %v557_v10 = vld [vmem:[%s779_s3 + $0x18] sm:$0xff]  }
   0x5   :  { %502 = vmatprep.subr.bf16.mxu1 %v594_v1 }
   0x6   :  { %483 = vmatpush3.bf16.msra.mxu0 %v546_v2 }
   0x7   :  { %484 = vmatprep.subr.bf16.mxu0 %v594_v1 }
   0x8   :  { %503 = vmatpush3.bf16.msra.mxu1 %v555_v6 }
   0x9   :  { %504 = vmatprep.subr.bf16.mxu1 %v594_v1 }
   0xa   :  { %485 = vmatpush3.bf16.msra.mxu0 %v547_v3 }
   0xb   :  { %486 = vmatprep.subr.bf16.mxu0 %v594_v1 }
   0xc   :  { %505 = vmatpush3.bf16.msra.mxu1 %v556_v8 }
   0xd   :  { %506 = vmatprep.subr.bf16.mxu1 %v594_v1 }
   0xe   :  { %487 = vmatpush3.bf16.msra.mxu0 %v548_v5 }
   0xf   :  { %488 = vmatprep.subr.bf16.mxu0 %v594_v1 }
  0x12   :  { %489 = vmatpush3.bf16.msra.mxu0 %v549_v7 }
  0x13   :  { %490 = vmatprep.subr.bf16.mxu0 %v594_v1 }
  0x14   :  { %14 = vsyncpa [#allocation3], 0  ;;  %v551_v11 = vld [vmem:[%s777_s1 + $0x30] sm:$0xff]   ;;  %507 = vmatpush3.bf16.msra.mxu1 %v557_v10  ;;  %v558_v12 = vld [vmem:[%s779_s3 + $0x20] sm:$0xff]   ;;  %s596_s11 = smov [#allocation2]  }
  0x15   :  { %508 = vmatprep.subr.bf16.mxu1 %v594_v1  ;;  %v552_v13 = vld [vmem:[%s777_s1 + $0x38] sm:$0xff]   ;;  %v553_v14 = vld [vmem:[%s776_s0] sm:$0xff]   ;;  %v559_v15 = vld [vmem:[%s779_s3 + $0x28] sm:$0xff]  }
  0x16   :  { %491 = vmatpush3.bf16.msra.mxu0 %v550_v9  ;;  %v560_v16 = vld [vmem:[%s779_s3 + $0x30] sm:$0xff]   ;;  %v561_v17 = vld [vmem:[%s779_s3 + $0x38] sm:$0xff]   ;;  %v562_v18 = vld [vmem:[%s781_s5] sm:$0xff]  }
  0x17   :  { %492 = vmatprep.subr.bf16.mxu0 %v594_v1  ;;  %v563_v19 = vld [vmem:[%s781_s5 + $0x8] sm:$0xff]   ;;  %v564_v20 = vld [vmem:[%s781_s5 + $0x10] sm:$0xff]   ;;  %v565_v21 = vld [vmem:[%s781_s5 + $0x18] sm:$0xff]  }
  0x18   :  { %509 = vmatpush3.bf16.msra.mxu1 %v558_v12  ;;  %v566_v22 = vld [vmem:[%s781_s5 + $0x20] sm:$0xff]   ;;  %v567_v35 = vld [vmem:[%s781_s5 + $0x28] sm:$0xff]   ;;  %v568_v36 = vld [vmem:[%s781_s5 + $0x30] sm:$0xff]  }
  0x19   :  { %510 = vmatprep.subr.bf16.mxu1 %v594_v1  ;;  %v416_v23 = vld [vmem:[%s778_s2] ss:$0 sm:$0xff]  ;;  %v569_v37 = vld [vmem:[%s781_s5 + $0x38] sm:$0xff]   ;;  %s403_s5 = sshll.u32 %s596_s11, 4  ;;  %s404_s5 = int_to_ptr.vmem [resolvable:$true] %s403_s5 }
  0x1a   :  { %493 = vmatpush3.bf16.msra.mxu0 %v551_v11  ;;  %v426_v38 = vld [vmem:[%s780_s4] ss:$0 sm:$0xff]  ;;  %s570_s12 = scalar_lea.vmem %s404_s5, 128  ;;  %p575_p1 = scmp.lt.s32.totalorder %s404_s5, %s404_s5 }
  0x1b   :  { %494 = vmatprep.subr.bf16.mxu0 %v594_v1  ;;  %p571_p0 = scmp.ne.s32.totalorder %s404_s5, %s570_s12  ;;  %p576_p2 = scmp.lt.s32.totalorder %s570_s12, %s570_s12 }
  0x1c   :  { %511 = vmatpush3.bf16.msra.mxu1 %v559_v15 }
  0x1d   :  { %512 = vmatprep.subr.bf16.mxu1 %v594_v1  ;;  %p577_p3 = por %p576_p2, %p575_p1 }
  0x1e   :  { %495 = vmatpush3.bf16.msra.mxu0 %v552_v13 }
  0x1f   :  { %520 = vmatprep.subr.bf16.mxu0 %v594_v1  ;;  %p578_p4 = pnand %p577_p3, %p571_p0 }
  0x20   :  { %513 = vmatpush3.bf16.msra.mxu1 %v560_v16 }
  0x21   :  { %497 = vmatmul.mubr.bf16.vlgmr.msra.gmra.mrb[0].mxu0 %v553_v14  ;;  %514 = vmatprep.subr.bf16.mxu1 %v594_v1 }
  0x22   :  { %536 = vmatprep.mubr.msk.bf16.mxu0 %vm595_vm0, %v594_v1  ;;  %521 = vmatpush3.bf16.msra.mxu0 %v562_v18 }
  0x23   :  { %522 = vmatprep.subr.bf16.mxu0 %v594_v1 }
  0x24   :  { %515 = vmatpush3.bf16.msra.mxu1 %v561_v17 }
  0x26   :  { %523 = vmatpush3.bf16.msra.mxu0 %v563_v19 }
  0x27   :  { %524 = vmatprep.subr.bf16.mxu0 %v594_v1 }
  0x2a   :  { %525 = vmatpush3.bf16.msra.mxu0 %v564_v20 }
  0x2b   :  { %526 = vmatprep.subr.bf16.mxu0 %v594_v1 }
  0x2e   :  { %527 = vmatpush3.bf16.msra.mxu0 %v565_v21 }
  0x2f   :  { %528 = vmatprep.subr.bf16.mxu0 %v594_v1 }
  0x32   :  { %529 = vmatpush3.bf16.msra.mxu0 %v566_v22 }
  0x33   :  { %530 = vmatprep.subr.bf16.mxu0 %v594_v1 }
  0x36   :  { %531 = vmatpush3.bf16.msra.mxu0 %v567_v35 }
  0x37   :  { %532 = vmatprep.subr.bf16.mxu0 %v594_v1 }
  0x3a   :  { %533 = vmatpush3.bf16.msra.mxu0 %v568_v36 }
  0x3b   :  { %534 = vmatprep.subr.bf16.mxu0 %v594_v1 }
  0x3e   :  { %535 = vmatpush3.bf16.msra.mxu0 %v569_v37 }
  0xf4   :  { %v143_v24 = vpop.f32.mrb[0].mxu0 }
  0xf5   :  { %v144_v25 = vadd.f32 %v416_v23, %v143_v24  ;;  %v498_v26 = vpop.f32.mrb[1].mxu0 }
  0xf6   :  { %v146_v27 = vpop.f32.mrb[2].mxu0 }
  0xf7   :  { %v150_v28 = vmul.f32 0.1, %v144_v25  ;;  %v147_v29 = vadd.f32 %v416_v23, %v146_v27  ;;  %v499_v30 = vpop.f32.mrb[3].mxu0 }
  0xf9   :  { %v151_v31 = vmul.f32 0.1, %v147_v29  ;;  %v152_v32 = vmax.f32 %v144_v25, %v150_v28 }
  0xfb   :  { %v153_v33 = vmax.f32 %v147_v29, %v151_v31 }
  0xfd   :  { %v154_v34 = vpack.c.bf16 %v153_v33, %v152_v32 }
  0xff   :  { %517 = vmatmul.mubr.bf16.vlgmr.msra.gmra.mrb[0].mxu1 %v154_v34 }
 0x1d2   :  { %v260_v39 = vpop.f32.mrb[0].mxu1 }
 0x1d3   :  { %v261_v40 = vadd.f32 %v426_v38, %v260_v39  ;;  %v518_v41 = vpop.f32.mrb[1].mxu1 }
 0x1d4   :  { %v263_v42 = vpop.f32.mrb[2].mxu1 }
 0x1d5   :  { %v267_v43 = vmul.f32 0.1, %v261_v40  ;;  %v264_v44 = vadd.f32 %v426_v38, %v263_v42  ;;  %v519_v45 = vpop.f32.mrb[3].mxu1 }
 0x1d7   :  { %v268_v46 = vmul.f32 0.1, %v264_v44  ;;  %v269_v47 = vmax.f32 %v261_v40, %v267_v43 }
 0x1d9   :  { %v270_v48 = vmax.f32 %v264_v44, %v268_v46 }
 0x1db   :  { %v271_v49 = vpack.c.bf16 %v270_v48, %v269_v47 }
 0x1dd   :  { %452 = vst [vmem:[#allocation2] sm:$0xff] %v271_v49   ;;  %537 = vmatmul.mubr.bf16.vlgmr.msra.gmra.mrb[4].mxu0 %v271_v49 }
 0x1de   :  { %581 = shalt.err (!%p578_p4)
}
 0x1df   :  { %s582_s13 = scalar_lea.hbm %s784_s8, 128 }
 0x1e0   :  { %p583_p5 = scmp.ne.s32.totalorder %s784_s8, %s582_s13  ;;  %p586_p6 = scmp.lt.u32.totalorder %s582_s13, %s784_s8 }
 0x1e2   :  { %p588_p7 = pnand %p586_p6, %p583_p5 }
 0x1e4   :  { %591 = shalt.err (!%p588_p7)
}
 0x1e5   :  { %s597_s17 = smov 64   ;;  %s598_s18 = smov 4   ;;  %v437_v50 = vld [vmem:[%s782_s6] ss:$0 sm:$0xff]  ;;  %vm393_vm1 = vcmask 23552  }
 0x1e6   :  { %409 = dma.vmem_to_hbm [thread:$0]  %s404_s5, 128, %s784_s8, [#allocation3], %s597_s17, %s597_s17, %s598_s18  }
 0x2b0   :  { %v386_v51 = vpop.f32.mrb[4].mxu0 }
 0x2b1   :  { %v387_v52 = vadd.f32 %v437_v50, %v386_v51  ;;  %v538_v53 = vpop.f32.mrb[5].mxu0 }
 0x2b2   :  { %v389_v54 = vpop.f32.mrb[6].mxu0 }
 0x2b3   :  { %394 = vst.msk [vmem:[%s783_s7] sm:$0xff] %vm393_vm1, %v387_v52  ;;  %v390_v55 = vadd.f32 %v437_v50, %v389_v54  ;;  %v539_v56 = vpop.f32.mrb[7].mxu0 }
 0x2b5   :  { %395 = vst.msk [vmem:[%s783_s7 + $0x8] sm:$0xff] %vm393_vm1, %v390_v55 }
 0x2b6   :  { %592 = dma.done.wait [#allocation3], 128  }
 0x2b7   :  { %593 = vsyncadd [#allocation3], 4294967168 }
 0x2b8   :  { %415 = vsyncpa [#allocation3], 1 }

</bundles_post_ra>
